<compile_context>
chip_gen: v7x
topology: tpu7x:2x2x1
jax: 0.10.0
libtpu: 0.0.40
codegen_flags: <defaults>
</compile_context>

<pallas_src>
import math
import jax
import jax.numpy as jnp
from jax import lax
from jax.experimental import pallas as pl
from jax.experimental.pallas import tpu as pltpu

# ----- problem sizes (small, consistent with the module's forward) -----
B = 2                  # batch
T = 8                  # tokens / sequence length
K = 8                  # in_dim (embedding dim of the block)
NUM_HEADS = 3
FF = 4 * K             # feed-forward hidden width = 32
NT = B * T             # 16 rows total
HK = NUM_HEADS * K     # 24
QKV_W = 3 * HK         # 72
EPS = 1e-5             # torch.nn.LayerNorm default
INV_SQRT_K = 1.0 / math.sqrt(K)
NEG_INF = -1e30
_LOG2_T = T.bit_length() - 1       # T is a power of two (8) -> shift instead of div


def transformer_block_kernel(x_ref, w_ref, vec_ref, o_ref):
    """Fused TransformerBlock forward, single invocation.

    x_ref   : (NT, K)        all tokens of all batches
    w_ref   : (2K+FF, 3HK)   weight slab:
                              rows [0 : K)        cols [0 : 3HK) -> fused QKV' weight
                                                  (V part pre-multiplied by unifyheads)
                              rows [K : 2K)       cols [0 : FF)  -> ff Linear1 weight
                              rows [2K : 2K+FF)   cols [0 : K)   -> ff Linear2 weight
    vec_ref : (7, FF)        rows = [unify bias, ln1 g, ln1 b, ff b2, ln2 g, ln2 b, ff b1]
    """
    x = x_ref[...]                                         # (NT, K)
    w_qkv = w_ref[0:K, 0:QKV_W]                            # (8, 72)
    w1 = w_ref[K:2 * K, 0:FF]                              # (8, 32)
    w2 = w_ref[2 * K:2 * K + FF, 0:K]                      # (32, 8)

    vecs = vec_ref[...]                                    # (7, 32)
    bu = vecs[0:1, 0:K]
    g1 = vecs[1:2, 0:K]
    be1 = vecs[2:3, 0:K]
    b2 = vecs[3:4, 0:K]
    g2 = vecs[4:5, 0:K]
    be2 = vecs[5:6, 0:K]
    b1 = vecs[6:7, 0:FF]

    # ---- fused projection: ONE MXU push for Q/K/V of all heads ----
    qkv = jnp.dot(x, w_qkv, preferred_element_type=jnp.float32)   # (NT, 3*HK)

    # ---- per-head scores, stacked along sublanes -> one softmax chain ----
    scores = []
    for h in range(NUM_HEADS):                             # static unroll (3 heads)
        q_h = qkv[:, h * K:(h + 1) * K]                    # (NT, K)
        k_h = qkv[:, HK + h * K: HK + (h + 1) * K]         # (NT, K)
        # q @ k^T without materializing a transpose
        scores.append(lax.dot_general(q_h, k_h, (((1,), (1,)), ((), ())),
                                      preferred_element_type=jnp.float32))
    s = jnp.concatenate(scores, axis=0)                    # (H*NT, NT)

    # in-kernel block-diagonal (same-batch) mask from iotas — no HBM operand
    rows = lax.broadcasted_iota(jnp.int32, (NUM_HEADS * NT, NT), 0)
    cols = lax.broadcasted_iota(jnp.int32, (NUM_HEADS * NT, NT), 1)
    q_batch = (rows & (NT - 1)) >> _LOG2_T                 # row = head*NT + token
    k_batch = cols >> _LOG2_T
    s = jnp.where(q_batch == k_batch, s * INV_SQRT_K, NEG_INF)

    # single fused softmax across all heads (one XLU reduce / EUP exp chain)
    s = s - jnp.max(s, axis=1, keepdims=True)
    e = jnp.exp(s)
    p = e * pl.reciprocal(jnp.sum(e, axis=1, keepdims=True), approx=True)

    # ---- attention output: P_h @ (x @ Wv_h @ Wu_h), head-sum on the VPU ----
    att = bu                                               # unifyheads bias
    for h in range(NUM_HEADS):
        p_h = p[h * NT:(h + 1) * NT, :]                    # (NT, NT)  aligned sublane slice
        vu_h = qkv[:, 2 * HK + h * K: 2 * HK + (h + 1) * K]  # (NT, K)  value (Wu folded in)
        att = att + jnp.dot(p_h, vu_h, preferred_element_type=jnp.float32)

    # ---- residual + LayerNorm1 ----
    xr = x + att
    mu1 = jnp.mean(xr, axis=1, keepdims=True)
    xc1 = xr - mu1
    var1 = jnp.mean(xc1 * xc1, axis=1, keepdims=True)
    xn = xc1 * lax.rsqrt(var1 + EPS) * g1 + be1

    # ---- feed-forward (batched over all NT rows) ----
    h1 = jnp.maximum(jnp.dot(xn, w1, preferred_element_type=jnp.float32) + b1, 0.0)
    y2 = jnp.dot(h1, w2, preferred_element_type=jnp.float32) + b2

    # ---- residual + LayerNorm2 ----
    xr2 = xn + y2
    mu2 = jnp.mean(xr2, axis=1, keepdims=True)
    xc2 = xr2 - mu2
    var2 = jnp.mean(xc2 * xc2, axis=1, keepdims=True)
    o_ref[...] = xc2 * lax.rsqrt(var2 + EPS) * g2 + be2    # single (NT, K) store


def _transformer_block(x, w_slab, vec_slab):
    """x: (B, T, K) float32 -> (B, T, K) float32."""
    x2 = x.reshape(NT, K)
    vmem = pl.BlockSpec(memory_space=pltpu.MemorySpace.VMEM)
    out = pl.pallas_call(
        transformer_block_kernel,
        out_shape=jax.ShapeDtypeStruct((NT, K), jnp.float32),
        in_specs=[vmem, vmem, vmem],
        out_specs=vmem,
        # single invocation: no grid, nothing to shard across TensorCores at this size
    )(x2, w_slab, vec_slab)
    return out.reshape(B, T, K)


transformer_block = jax.jit(_transformer_block)


# ---------------- parameter init / packing ----------------
def init_params(key):
    ks = jax.random.split(key, 13)
    f32 = jnp.float32
    # per-head weights: torch Linear(K, K*H) viewed as H blocks of (K, K), applied x @ W_h
    wq3 = 0.3 * jax.random.normal(ks[0], (NUM_HEADS, K, K), dtype=f32)   # toqueries (no bias)
    wk3 = 0.3 * jax.random.normal(ks[1], (NUM_HEADS, K, K), dtype=f32)   # tokeys    (no bias)
    wv3 = 0.3 * jax.random.normal(ks[2], (NUM_HEADS, K, K), dtype=f32)   # tovalues  (no bias)
    wu3 = 0.3 * jax.random.normal(ks[3], (NUM_HEADS, K, K), dtype=f32)   # unifyheads weight rows
    bu = 0.1 * jax.random.normal(ks[4], (K,), dtype=f32)                 # unifyheads bias
    g1 = 1.0 + 0.1 * jax.random.normal(ks[5], (K,), dtype=f32)           # norm1 weight
    be1 = 0.1 * jax.random.normal(ks[6], (K,), dtype=f32)                # norm1 bias
    w1 = 0.2 * jax.random.normal(ks[7], (K, FF), dtype=f32)              # ff Linear1
    b1 = 0.1 * jax.random.normal(ks[8], (FF,), dtype=f32)
    w2 = 0.2 * jax.random.normal(ks[9], (FF, K), dtype=f32)              # ff Linear2
    b2 = 0.1 * jax.random.normal(ks[10], (K,), dtype=f32)
    g2 = 1.0 + 0.1 * jax.random.normal(ks[11], (K,), dtype=f32)          # norm2 weight
    be2 = 0.1 * jax.random.normal(ks[12], (K,), dtype=f32)               # norm2 bias
    return (wq3, wk3, wv3, wu3, bu, g1, be1, b1, b2, g2, be2, w1, w2)


def pack_params(raw):
    """One-time packing of all weights into two VMEM slabs (3 DMAs total per call)."""
    wq3, wk3, wv3, wu3, bu, g1, be1, b1, b2, g2, be2, w1, w2 = raw
    wq = jnp.concatenate([wq3[h] for h in range(NUM_HEADS)], axis=1)                # (K, HK)
    wk = jnp.concatenate([wk3[h] for h in range(NUM_HEADS)], axis=1)                # (K, HK)
    # fold unifyheads into the value projection: x @ (Wv_h @ Wu_h)  (exact reparametrization)
    wvu = jnp.concatenate([wv3[h] @ wu3[h] for h in range(NUM_HEADS)], axis=1)      # (K, HK)
    w_qkv = jnp.concatenate([wq, wk, wvu], axis=1)                                  # (K, 3*HK)

    w_slab = jnp.zeros((2 * K + FF, QKV_W), jnp.float32)                            # (48, 72)
    w_slab = w_slab.at[0:K, :].set(w_qkv)
    w_slab = w_slab.at[K:2 * K, 0:FF].set(w1)
    w_slab = w_slab.at[2 * K:2 * K + FF, 0:K].set(w2)

    pad = lambda v: jnp.pad(v, (0, FF - v.shape[0]))
    vec_slab = jnp.stack([pad(bu), pad(g1), pad(be1), pad(b2), pad(g2), pad(be2), b1],
                         axis=0)                                                    # (7, 32)
    return jax.device_put(w_slab), jax.device_put(vec_slab)


# ---------------- pure-JAX reference (mirrors the torch forward) ----------------
def _layernorm(v, g, b):
    mu = jnp.mean(v, axis=-1, keepdims=True)
    var = jnp.mean((v - mu) ** 2, axis=-1, keepdims=True)
    return (v - mu) / jnp.sqrt(var + EPS) * g + b


def ref_forward(x3, raw):
    wq3, wk3, wv3, wu3, bu, g1, be1, b1, b2, g2, be2, w1, w2 = raw
    att = jnp.zeros_like(x3)
    for h in range(NUM_HEADS):
        q = jnp.einsum('btk,kd->btd', x3, wq3[h])
        kk = jnp.einsum('btk,kd->btd', x3, wk3[h])
        v = jnp.einsum('btk,kd->btd', x3, wv3[h])
        s = jnp.einsum('btd,bsd->bts', q, kk) * INV_SQRT_K
        w = jax.nn.softmax(s, axis=-1)
        y = jnp.einsum('bts,bsd->btd', w, v)
        att = att + jnp.einsum('btd,dk->btk', y, wu3[h])
    att = att + bu
    xn = _layernorm(x3 + att, g1, be1)
    y2 = jnp.maximum(jnp.einsum('btk,kf->btf', xn, w1) + b1, 0.0)
    y2 = jnp.einsum('btf,fk->btk', y2, w2) + b2
    return _layernorm(xn + y2, g2, be2)


if __name__ == "__main__":
    key = jax.random.PRNGKey(0)
    k_state, k_params = jax.random.split(key)
    x = jax.random.normal(k_state, (B, T, K), dtype=jnp.float32)
    raw = init_params(k_params)
    w_slab, vec_slab = pack_params(raw)

    out = transformer_block(x, w_slab, vec_slab)
    out = jax.block_until_ready(out)

    assert out.shape == (B, T, K), out.shape
    assert bool(jnp.all(jnp.isfinite(out)))

    ref = ref_forward(x, raw)
    err = float(jnp.max(jnp.abs(out - ref)))
    assert err < 5e-2, f"max abs error vs reference: {err}"
    print("KERNEL_OK")
</pallas_src>

<mosaic_0001>
module attributes {stable_mosaic.version = 11 : i64} {
  func.func @transformer_block_kernel(%arg0: memref<16x8xf32, #tpu.memory_space<vmem>>, %arg1: memref<48x72xf32, #tpu.memory_space<vmem>>, %arg2: memref<7x32xf32, #tpu.memory_space<vmem>>, %arg3: memref<16x8xf32, #tpu.memory_space<vmem>>) attributes {dimension_semantics = [], scalar_prefetch = 0 : i64, scratch_operands = 0 : i64, tpu.core_type = #tpu.core_type<tc>} {
    %c0 = arith.constant 0 : index
    %c0_0 = arith.constant 0 : index
    %0 = vector.load %arg0[%c0, %c0_0] : memref<16x8xf32, #tpu.memory_space<vmem>>, vector<16x8xf32>
    %c0_1 = arith.constant 0 : index
    %c0_2 = arith.constant 0 : index
    %1 = vector.load %arg1[%c0_1, %c0_2] : memref<48x72xf32, #tpu.memory_space<vmem>>, vector<8x72xf32>
    %c8 = arith.constant 8 : index
    %c0_3 = arith.constant 0 : index
    %2 = vector.load %arg1[%c8, %c0_3] : memref<48x72xf32, #tpu.memory_space<vmem>>, vector<8x32xf32>
    %c16 = arith.constant 16 : index
    %c0_4 = arith.constant 0 : index
    %3 = vector.load %arg1[%c16, %c0_4] : memref<48x72xf32, #tpu.memory_space<vmem>>, vector<32x8xf32>
    %c0_5 = arith.constant 0 : index
    %c0_6 = arith.constant 0 : index
    %4 = vector.load %arg2[%c0_5, %c0_6] : memref<7x32xf32, #tpu.memory_space<vmem>>, vector<7x32xf32>
    %5 = vector.extract_strided_slice %4 {offsets = [0, 0], sizes = [1, 8], strides = [1, 1]} : vector<7x32xf32> to vector<1x8xf32>
    %6 = vector.extract_strided_slice %4 {offsets = [1, 0], sizes = [1, 8], strides = [1, 1]} : vector<7x32xf32> to vector<1x8xf32>
    %7 = vector.extract_strided_slice %4 {offsets = [2, 0], sizes = [1, 8], strides = [1, 1]} : vector<7x32xf32> to vector<1x8xf32>
    %8 = vector.extract_strided_slice %4 {offsets = [3, 0], sizes = [1, 8], strides = [1, 1]} : vector<7x32xf32> to vector<1x8xf32>
    %9 = vector.extract_strided_slice %4 {offsets = [4, 0], sizes = [1, 8], strides = [1, 1]} : vector<7x32xf32> to vector<1x8xf32>
    %10 = vector.extract_strided_slice %4 {offsets = [5, 0], sizes = [1, 8], strides = [1, 1]} : vector<7x32xf32> to vector<1x8xf32>
    %11 = vector.extract_strided_slice %4 {offsets = [6, 0], sizes = [1, 32], strides = [1, 1]} : vector<7x32xf32> to vector<1x32xf32>
    %cst = arith.constant dense<0.000000e+00> : vector<16x72xf32>
    %12 = tpu.matmul %0, %1, %cst {dimension_numbers = #tpu.dot_dimension_numbers<[1], [0], [0], [1], [0, 0, 1, 1], [], []>} : vector<16x8xf32>, vector<8x72xf32>, vector<16x72xf32> -> vector<16x72xf32>
    %13 = vector.extract_strided_slice %12 {offsets = [0, 0], sizes = [16, 8], strides = [1, 1]} : vector<16x72xf32> to vector<16x8xf32>
    %14 = vector.extract_strided_slice %12 {offsets = [0, 24], sizes = [16, 8], strides = [1, 1]} : vector<16x72xf32> to vector<16x8xf32>
    %cst_7 = arith.constant dense<0.000000e+00> : vector<16x16xf32>
    %15 = tpu.matmul %13, %14, %cst_7 {dimension_numbers = #tpu.dot_dimension_numbers<[1], [1], [0], [0], [0, 0, 1, 0], [], []>} : vector<16x8xf32>, vector<16x8xf32>, vector<16x16xf32> -> vector<16x16xf32>
    %16 = vector.extract_strided_slice %12 {offsets = [0, 8], sizes = [16, 8], strides = [1, 1]} : vector<16x72xf32> to vector<16x8xf32>
    %17 = vector.extract_strided_slice %12 {offsets = [0, 32], sizes = [16, 8], strides = [1, 1]} : vector<16x72xf32> to vector<16x8xf32>
    %cst_8 = arith.constant dense<0.000000e+00> : vector<16x16xf32>
    %18 = tpu.matmul %16, %17, %cst_8 {dimension_numbers = #tpu.dot_dimension_numbers<[1], [1], [0], [0], [0, 0, 1, 0], [], []>} : vector<16x8xf32>, vector<16x8xf32>, vector<16x16xf32> -> vector<16x16xf32>
    %19 = vector.extract_strided_slice %12 {offsets = [0, 16], sizes = [16, 8], strides = [1, 1]} : vector<16x72xf32> to vector<16x8xf32>
    %20 = vector.extract_strided_slice %12 {offsets = [0, 40], sizes = [16, 8], strides = [1, 1]} : vector<16x72xf32> to vector<16x8xf32>
    %cst_9 = arith.constant dense<0.000000e+00> : vector<16x16xf32>
    %21 = tpu.matmul %19, %20, %cst_9 {dimension_numbers = #tpu.dot_dimension_numbers<[1], [1], [0], [0], [0, 0, 1, 0], [], []>} : vector<16x8xf32>, vector<16x8xf32>, vector<16x16xf32> -> vector<16x16xf32>
    %22 = tpu.concatenate %15, %18, %21 in 0 : vector<16x16xf32>, vector<16x16xf32>, vector<16x16xf32> -> vector<48x16xf32>
    %23 = tpu.iota {dimensions = array<i32: 0>} : vector<48x16xi32>
    %24 = tpu.iota {dimensions = array<i32: 1>} : vector<48x16xi32>
    %c15_i32 = arith.constant 15 : i32
    %25 = vector.broadcast %c15_i32 : i32 to vector<48x16xi32>
    %26 = arith.andi %23, %25 : vector<48x16xi32>
    %c3_i32 = arith.constant 3 : i32
    %27 = vector.broadcast %c3_i32 : i32 to vector<48x16xi32>
    %28 = arith.shrsi %26, %27 : vector<48x16xi32>
    %c3_i32_10 = arith.constant 3 : i32
    %29 = vector.broadcast %c3_i32_10 : i32 to vector<48x16xi32>
    %30 = arith.shrsi %24, %29 : vector<48x16xi32>
    %31 = arith.cmpi eq, %28, %30 : vector<48x16xi32>
    %cst_11 = arith.constant 0.353553385 : f32
    %32 = vector.broadcast %cst_11 : f32 to vector<48x16xf32>
    %33 = arith.mulf %22, %32 : vector<48x16xf32>
    %cst_12 = arith.constant -1.000000e+30 : f32
    %34 = vector.broadcast %cst_12 : f32 to vector<48x16xf32>
    %35 = arith.select %31, %33, %34 : vector<48x16xi1>, vector<48x16xf32>
    %cst_13 = arith.constant dense<0xFF800000> : vector<48xf32>
    %36 = vector.multi_reduction <maximumf>, %35, %cst_13 [1] : vector<48x16xf32> to vector<48xf32>
    %37 = vector.shape_cast %36 : vector<48xf32> to vector<48x1xf32>
    %38 = vector.broadcast %37 : vector<48x1xf32> to vector<48x16xf32>
    %39 = arith.subf %35, %38 : vector<48x16xf32>
    %40 = math.exp %39 : vector<48x16xf32>
    %cst_14 = arith.constant dense<0.000000e+00> : vector<48xf32>
    %41 = vector.multi_reduction <add>, %40, %cst_14 [1] : vector<48x16xf32> to vector<48xf32>
    %42 = vector.shape_cast %41 : vector<48xf32> to vector<48x1xf32>
    %43 = tpu.reciprocal %42 {approx = true} : vector<48x1xf32> -> vector<48x1xf32>
    %44 = vector.broadcast %43 : vector<48x1xf32> to vector<48x16xf32>
    %45 = arith.mulf %40, %44 : vector<48x16xf32>
    %46 = vector.extract_strided_slice %45 {offsets = [0, 0], sizes = [16, 16], strides = [1, 1]} : vector<48x16xf32> to vector<16x16xf32>
    %47 = vector.extract_strided_slice %12 {offsets = [0, 48], sizes = [16, 8], strides = [1, 1]} : vector<16x72xf32> to vector<16x8xf32>
    %cst_15 = arith.constant dense<0.000000e+00> : vector<16x8xf32>
    %48 = tpu.matmul %46, %47, %cst_15 {dimension_numbers = #tpu.dot_dimension_numbers<[1], [0], [0], [1], [0, 0, 1, 1], [], []>} : vector<16x16xf32>, vector<16x8xf32>, vector<16x8xf32> -> vector<16x8xf32>
    %49 = vector.broadcast %5 : vector<1x8xf32> to vector<16x8xf32>
    %50 = arith.addf %49, %48 : vector<16x8xf32>
    %51 = vector.extract_strided_slice %45 {offsets = [16, 0], sizes = [16, 16], strides = [1, 1]} : vector<48x16xf32> to vector<16x16xf32>
    %52 = vector.extract_strided_slice %12 {offsets = [0, 56], sizes = [16, 8], strides = [1, 1]} : vector<16x72xf32> to vector<16x8xf32>
    %cst_16 = arith.constant dense<0.000000e+00> : vector<16x8xf32>
    %53 = tpu.matmul %51, %52, %cst_16 {dimension_numbers = #tpu.dot_dimension_numbers<[1], [0], [0], [1], [0, 0, 1, 1], [], []>} : vector<16x16xf32>, vector<16x8xf32>, vector<16x8xf32> -> vector<16x8xf32>
    %54 = arith.addf %50, %53 : vector<16x8xf32>
    %55 = vector.extract_strided_slice %45 {offsets = [32, 0], sizes = [16, 16], strides = [1, 1]} : vector<48x16xf32> to vector<16x16xf32>
    %56 = vector.extract_strided_slice %12 {offsets = [0, 64], sizes = [16, 8], strides = [1, 1]} : vector<16x72xf32> to vector<16x8xf32>
    %cst_17 = arith.constant dense<0.000000e+00> : vector<16x8xf32>
    %57 = tpu.matmul %55, %56, %cst_17 {dimension_numbers = #tpu.dot_dimension_numbers<[1], [0], [0], [1], [0, 0, 1, 1], [], []>} : vector<16x16xf32>, vector<16x8xf32>, vector<16x8xf32> -> vector<16x8xf32>
    %58 = arith.addf %54, %57 : vector<16x8xf32>
    %59 = arith.addf %0, %58 : vector<16x8xf32>
    %cst_18 = arith.constant dense<0.000000e+00> : vector<16xf32>
    %60 = vector.multi_reduction <add>, %59, %cst_18 [1] : vector<16x8xf32> to vector<16xf32>
    %61 = vector.shape_cast %60 : vector<16xf32> to vector<16x1xf32>
    %cst_19 = arith.constant 8.000000e+00 : f32
    %62 = vector.broadcast %cst_19 : f32 to vector<16x1xf32>
    %63 = arith.divf %61, %62 : vector<16x1xf32>
    %64 = vector.broadcast %63 : vector<16x1xf32> to vector<16x8xf32>
    %65 = arith.subf %59, %64 : vector<16x8xf32>
    %66 = arith.mulf %65, %65 : vector<16x8xf32>
    %cst_20 = arith.constant dense<0.000000e+00> : vector<16xf32>
    %67 = vector.multi_reduction <add>, %66, %cst_20 [1] : vector<16x8xf32> to vector<16xf32>
    %68 = vector.shape_cast %67 : vector<16xf32> to vector<16x1xf32>
    %cst_21 = arith.constant 8.000000e+00 : f32
    %69 = vector.broadcast %cst_21 : f32 to vector<16x1xf32>
    %70 = arith.divf %68, %69 : vector<16x1xf32>
    %cst_22 = arith.constant 9.99999974E-6 : f32
    %71 = vector.broadcast %cst_22 : f32 to vector<16x1xf32>
    %72 = arith.addf %70, %71 : vector<16x1xf32>
    %73 = math.rsqrt %72 : vector<16x1xf32>
    %74 = vector.broadcast %73 : vector<16x1xf32> to vector<16x8xf32>
    %75 = arith.mulf %65, %74 : vector<16x8xf32>
    %76 = vector.broadcast %6 : vector<1x8xf32> to vector<16x8xf32>
    %77 = arith.mulf %75, %76 : vector<16x8xf32>
    %78 = vector.broadcast %7 : vector<1x8xf32> to vector<16x8xf32>
    %79 = arith.addf %77, %78 : vector<16x8xf32>
    %cst_23 = arith.constant dense<0.000000e+00> : vector<16x32xf32>
    %80 = tpu.matmul %79, %2, %cst_23 {dimension_numbers = #tpu.dot_dimension_numbers<[1], [0], [0], [1], [0, 0, 1, 1], [], []>} : vector<16x8xf32>, vector<8x32xf32>, vector<16x32xf32> -> vector<16x32xf32>
    %81 = vector.broadcast %11 : vector<1x32xf32> to vector<16x32xf32>
    %82 = arith.addf %80, %81 : vector<16x32xf32>
    %cst_24 = arith.constant 0.000000e+00 : f32
    %83 = vector.broadcast %cst_24 : f32 to vector<16x32xf32>
    %84 = arith.maximumf %82, %83 : vector<16x32xf32>
    %cst_25 = arith.constant dense<0.000000e+00> : vector<16x8xf32>
    %85 = tpu.matmul %84, %3, %cst_25 {dimension_numbers = #tpu.dot_dimension_numbers<[1], [0], [0], [1], [0, 0, 1, 1], [], []>} : vector<16x32xf32>, vector<32x8xf32>, vector<16x8xf32> -> vector<16x8xf32>
    %86 = vector.broadcast %8 : vector<1x8xf32> to vector<16x8xf32>
    %87 = arith.addf %85, %86 : vector<16x8xf32>
    %88 = arith.addf %79, %87 : vector<16x8xf32>
    %cst_26 = arith.constant dense<0.000000e+00> : vector<16xf32>
    %89 = vector.multi_reduction <add>, %88, %cst_26 [1] : vector<16x8xf32> to vector<16xf32>
    %90 = vector.shape_cast %89 : vector<16xf32> to vector<16x1xf32>
    %cst_27 = arith.constant 8.000000e+00 : f32
    %91 = vector.broadcast %cst_27 : f32 to vector<16x1xf32>
    %92 = arith.divf %90, %91 : vector<16x1xf32>
    %93 = vector.broadcast %92 : vector<16x1xf32> to vector<16x8xf32>
    %94 = arith.subf %88, %93 : vector<16x8xf32>
    %95 = arith.mulf %94, %94 : vector<16x8xf32>
    %cst_28 = arith.constant dense<0.000000e+00> : vector<16xf32>
    %96 = vector.multi_reduction <add>, %95, %cst_28 [1] : vector<16x8xf32> to vector<16xf32>
    %97 = vector.shape_cast %96 : vector<16xf32> to vector<16x1xf32>
    %cst_29 = arith.constant 8.000000e+00 : f32
    %98 = vector.broadcast %cst_29 : f32 to vector<16x1xf32>
    %99 = arith.divf %97, %98 : vector<16x1xf32>
    %cst_30 = arith.constant 9.99999974E-6 : f32
    %100 = vector.broadcast %cst_30 : f32 to vector<16x1xf32>
    %101 = arith.addf %99, %100 : vector<16x1xf32>
    %102 = math.rsqrt %101 : vector<16x1xf32>
    %103 = vector.broadcast %102 : vector<16x1xf32> to vector<16x8xf32>
    %104 = arith.mulf %94, %103 : vector<16x8xf32>
    %105 = vector.broadcast %9 : vector<1x8xf32> to vector<16x8xf32>
    %106 = arith.mulf %104, %105 : vector<16x8xf32>
    %107 = vector.broadcast %10 : vector<1x8xf32> to vector<16x8xf32>
    %108 = arith.addf %106, %107 : vector<16x8xf32>
    %c0_31 = arith.constant 0 : index
    %c0_32 = arith.constant 0 : index
    %109 = vector.load %arg3[%c0_31, %c0_32] : memref<16x8xf32, #tpu.memory_space<vmem>>, vector<16x8xf32>
    tpu.vector_store %arg3[%c0_31, %c0_32], %108 {strides = array<i32>} : memref<16x8xf32, #tpu.memory_space<vmem>>, vector<16x8xf32>,
    return
  }
}

</mosaic_0001>

<bundles_post_ra>
// kernel: _transformer_block.1
= control target key start
LH: loop header
LB: loop body
LE: loop exit
PB: predicated region body
PF: predicated region fallthrough
CT: control target
= control target key end

     0   :  { %8 = vsyncpa [#allocation3], 0  ;;  %s1548_s0 = inlined_call_operand.hbm [shape: f32[16,8], index: 0, kind: input, shape index: {}]   ;;  %s1549_s1 = inlined_call_operand.hbm [shape: f32[48,72], index: 1, kind: input, shape index: {}]   ;;  %s1550_s2 = inlined_call_operand.vmem [shape: f32[7,32], index: 2, kind: input, shape index: {}]   ;;  %s1551_s3 = inlined_call_operand.hbm [shape: f32[16,8], index: 3, kind: output, shape index: {}]  }
   0x1   :  { %9 = vsyncpa [#allocation6], 0 }
   0x2   :  { %10 = vsyncpa [#allocation4], 0  ;;  %s1371_s12 = smov [#allocation2]   ;;  %s1299_s16 = scalar_lea.hbm %s1548_s0, 256 }
   0x3   :  { %s16_s13 = sshll.u32 %s1371_s12, 4  ;;  %p1300_p0 = scmp.ne.s32.totalorder %s1548_s0, %s1299_s16  ;;  %s17_s13 = int_to_ptr.vmem [resolvable:$true] %s16_s13 }
   0x4   :  { %p1303_p1 = scmp.lt.u32.totalorder %s1299_s16, %s1548_s0 }
   0x6   :  { %p1305_p2 = pnand %p1303_p1, %p1300_p0 }
   0x8   :  { %1308 = shalt.err (!%p1305_p2)
}
   0x9   :  { %s1309_s21 = scalar_lea.vmem %s17_s13, 256  ;;  %p1314_p4 = scmp.lt.s32.totalorder %s17_s13, %s17_s13 }
   0xa   :  { %p1310_p3 = scmp.ne.s32.totalorder %s17_s13, %s1309_s21  ;;  %p1315_p5 = scmp.lt.s32.totalorder %s1309_s21, %s1309_s21 }
   0xc   :  { %p1316_p6 = por %p1315_p5, %p1314_p4 }
   0xe   :  { %p1317_p7 = pnand %p1316_p6, %p1310_p3 }
  0x10   :  { %1320 = shalt.err (!%p1317_p7)
}
  0x11   :  { %s1372_s22 = smov 128   ;;  %s1373_s23 = smov 8  }
  0x12   :  { %22 = dma.hbm_to_vmem [thread:$0]  %s1548_s0, 256, %s17_s13, [#allocation3], %s1372_s22, %s1372_s22, %s1373_s23  }
  0x13   :  { %s1374_s26 = smov [#allocation5]   ;;  %s1321_s30 = scalar_lea.hbm %s1549_s1, 768 }
  0x14   :  { %s28_s27 = sshll.u32 %s1374_s26, 4  ;;  %p1322_p8 = scmp.ne.s32.totalorder %s1549_s1, %s1321_s30  ;;  %s29_s27 = int_to_ptr.vmem [resolvable:$true] %s28_s27 }
  0x15   :  { %p1325_p9 = scmp.lt.u32.totalorder %s1321_s30, %s1549_s1 }
  0x17   :  { %p1327_p10 = pnand %p1325_p9, %p1322_p8 }
  0x19   :  { %1330 = shalt.err (!%p1327_p10)
}
  0x1a   :  { %s1331_s8 = scalar_lea.vmem %s29_s27, 768  ;;  %p1336_p12 = scmp.lt.s32.totalorder %s29_s27, %s29_s27 }
  0x1b   :  { %p1332_p11 = scmp.ne.s32.totalorder %s29_s27, %s1331_s8  ;;  %p1337_p13 = scmp.lt.s32.totalorder %s1331_s8, %s1331_s8 }
  0x1d   :  { %p1338_p0 = por %p1337_p13, %p1336_p12 }
  0x1f   :  { %p1339_p1 = pnand %p1338_p0, %p1332_p11 }
  0x21   :  { %1342 = shalt.err (!%p1339_p1)
}
  0x22   :  { %34 = dma.hbm_to_vmem [thread:$0]  %s1549_s1, 768, %s29_s27, [#allocation6], %s1372_s22, %s1372_s22, %s1373_s23  }
  0x23   :  { %1365 = dma.done.wait [#allocation3], 256  }
  0x24   :  { %1366 = vsyncadd [#allocation3], 4294967040 }
  0x25   :  { %1367 = dma.done.wait [#allocation6], 768  }
  0x26   :  { %1368 = vsyncadd [#allocation6], 4294966528  ;;  %vm52_vm0 = vcmask 64512   ;;  %v45_v0 = vld [vmem:[#allocation5] sm:$0xff]  ;;  %v1434_v1 = vld [vmem:[#allocation2] sm:$0xff]  ;;  %s1375_s1 = smov 88   ;;  %v405_v23 = vlaneseq }
  0x27   :  { %v1436_v2 = vld [vmem:[#allocation2 + $0x8] sm:$0xff]  ;;  %1117 = vmatprep.subr.mxu0 %v45_v0  ;;  %1119 = vmatprep.mubr.msk.f32.mxu0 %vm52_vm0, %v1434_v1  ;;  %s1376_s10 = smov 104   ;;  %s1377_s11 = smov 120   ;;  %vm1450_vm1 = vmpackc.low %vm52_vm0, %vm52_vm0  ;;  %vm445_vm3 = vcmask 130048   ;;  %vm915_vm9 = vcmask 261120  }
  0x28   :  { %1118 = vmatpush3.msra.mxu0 %v45_v0  ;;  %s1378_s12 = smov 96   ;;  %s1379_s13 = smov 112   ;;  %v1471_v24 = vshrl.u32 %v405_v23, 7  ;;  %v413_v26 = vand.u32 127, %v405_v23 }
  0x29   :  { %1120 = vmatmul.mubr.msk.f32.vlgmr.msra.gmra.mrb[0].mxu0 %vm52_vm0, %v1436_v2  ;;  %s1380_s14 = smov 72   ;;  %s1381_s15 = smov 64  }
  0x2a   :  { %v407_v25 = vadd.s32 8, %v1471_v24  ;;  %v409_v28 = vadd.s32 24, %v1471_v24  ;;  %v414_v29 = vand.u32 15, %v1471_v24  ;;  %v408_v30 = vadd.s32 16, %v1471_v24  ;;  %s1382_s16 = smov 80  }
  0x2b   :  { %v426_v32 = vshra.s32 %v413_v26, 3  ;;  %v411_v34 = vadd.s32 40, %v1471_v24  ;;  %v410_v37 = vadd.s32 32, %v1471_v24 }
  0x2c   :  { %v415_v27 = vand.u32 15, %v407_v25  ;;  %v417_v33 = vand.u32 15, %v409_v28  ;;  %v420_v35 = vshra.s32 %v414_v29, 3  ;;  %v416_v36 = vand.u32 15, %v408_v30 }
  0x2d   :  { %v419_v40 = vand.u32 15, %v411_v34  ;;  %v418_v44 = vand.u32 15, %v410_v37 }
  0x2e   :  { %v421_v31 = vshra.s32 %v415_v27, 3  ;;  %v423_v39 = vshra.s32 %v417_v33, 3  ;;  %vm427_vm4 = vcmp.eq.s32.totalorder %v420_v35, %v426_v32  ;;  %v422_v43 = vshra.s32 %v416_v36, 3 }
  0x2f   :  { %v425_v50 = vshra.s32 %v419_v40, 3  ;;  %v424_v54 = vshra.s32 %v418_v44, 3 }
  0x30   :  { %vm428_vm2 = vcmp.eq.s32.totalorder %v421_v31, %v426_v32  ;;  %vm430_vm5 = vcmp.eq.s32.totalorder %v423_v39, %v426_v32  ;;  %vm429_vm6 = vcmp.eq.s32.totalorder %v422_v43, %v426_v32 }
  0x31   :  { %vm432_vm7 = vcmp.eq.s32.totalorder %v425_v50, %v426_v32  ;;  %vm431_vm8 = vcmp.eq.s32.totalorder %v424_v54, %v426_v32 }
  0xfc   :  { %v1121_v3 = vpop.f32.mrb[0].mxu0 }
  0xfd   :  { %v125_v4 = vpop.f32.mrb[1].mxu0 }
  0xfe   :  { %1126 = vmatprep.mubr.msk.f32.mxu1 %vm52_vm0, %v125_v4  ;;  %v1443_v5 = vpack.i.bf16 %v1121_v3, %v125_v4 }
 0x100   :  { %1248 = vrot.lane.b32.xlu1 %v1443_v5, %s1375_s1  ;;  %1238 = vrot.lane.b32.xlu0 %v1443_v5, %s1376_s10 }
 0x104   :  { %223 = vrot.lane.b32.xlu1 %v125_v4, %s1377_s11  ;;  %1243 = vrot.lane.b32.xlu0 %v1443_v5, %s1378_s12 }
 0x108   :  { %314 = vrot.lane.b32.xlu1 %v125_v4, %s1379_s13  ;;  %225 = vrot.lane.b32.xlu0 %v1121_v3, %s1377_s11 }
 0x10c   :  { %316 = vrot.lane.b32.xlu0 %v1121_v3, %s1379_s13 }
 0x172   :  { %v1249_v6 = vpop.permute.xlu1 %1248  ;;  %v1239_v7 = vpop.permute.xlu0 %1238 }
 0x173   :  { %v1251_v8 = vunpack.i.h.bf16 %v1249_v6  ;;  %v1250_v9 = vunpack.i.l.bf16 %v1249_v6  ;;  %v1241_v10 = vunpack.i.h.bf16 %v1239_v7  ;;  %v1240_v11 = vunpack.i.l.bf16 %v1239_v7 }
 0x175   :  { %v1180_v13 = vpack.c.bf16 %v1241_v10, %v1240_v11  ;;  %v1192_v16 = vpack.c.bf16 %v1251_v8, %v1250_v9 }
 0x176   :  { %v224_v14 = vpop.permute.xlu1 %223  ;;  %v1244_v15 = vpop.permute.xlu0 %1243 }
 0x177   :  { %v1246_v17 = vunpack.i.h.bf16 %v1244_v15  ;;  %v1245_v18 = vunpack.i.l.bf16 %v1244_v15  ;;  %1182 = vmatprep.subr.msk.bf16.mxu1 %vm1450_vm1, %v1180_v13  ;;  %1133 = vmatprep.mubr.msk.f32.mxu0 %vm52_vm0, %v224_v14 }
 0x178   :  { %1185 = vmatpush3.bf16.xpose.msk.msra.mxu1 %vm1450_vm1, %v1180_v13 }
 0x179   :  { %v1186_v19 = vpack.c.bf16 %v1246_v17, %v1245_v18  ;;  %1194 = vmatprep.subr.msk.bf16.mxu1 %vm1450_vm1, %v1192_v16 }
 0x17a   :  { %v315_v20 = vpop.permute.xlu1 %314  ;;  %v226_v21 = vpop.permute.xlu0 %225 }
 0x17b   :  { %1188 = vmatprep.subr.msk.bf16.mxu0 %vm1450_vm1, %v1186_v19 }
 0x17c   :  { %1191 = vmatpush3.bf16.xpose.msk.msra.mxu0 %vm1450_vm1, %v1186_v19 }
 0x17e   :  { %v317_v22 = vpop.permute.xlu0 %316 }
 0x17f   :  { %1127 = vmatmul.mubr.msk.f32.vlgmr.msra.gmra.mrb[0].mxu1 %vm52_vm0, %v1121_v3 }
 0x180   :  { %1197 = vmatpush3.bf16.xpose.msk.msra.mxu1 %vm1450_vm1, %v1192_v16  ;;  %1140 = vmatprep.mubr.msk.f32.mxu1 %vm52_vm0, %v315_v20 }
 0x183   :  { %1134 = vmatmul.mubr.msk.f32.vlgmr.msra.gmra.mrb[2].mxu0 %vm52_vm0, %v226_v21 }
 0x187   :  { %1141 = vmatmul.mubr.msk.f32.vlgmr.msra.gmra.mrb[2].mxu1 %vm52_vm0, %v317_v22 }
 0x252   :  { %v1128_v38 = vpop.f32.mrb[0].mxu1 }
 0x253   :  { %v434_v41 = vmul.f32 0.35355338, %v1128_v38  ;;  %v214_v42 = vpop.f32.mrb[1].mxu1 }
 0x254   :  { %v433_v45 = vmul.f32 0.35355338, %v214_v42 }
 0x255   :  { %v440_v46 = vsel %vm428_vm2, %v434_v41, -1e+30 }
 0x256   :  { %v1135_v47 = vpop.f32.mrb[2].mxu0  ;;  %v449_v48 = vsel %vm445_vm3, %v440_v46, -inf  ;;  %v439_v49 = vsel %vm427_vm4, %v433_v45, -1e+30 }
 0x257   :  { %v436_v51 = vmul.f32 0.35355338, %v1135_v47  ;;  %v305_v52 = vpop.f32.mrb[3].mxu0  ;;  %450 = vmax.xlane.f32.xlu0 %v449_v48  ;;  %v446_v53 = vsel %vm445_vm3, %v439_v49, -inf }
 0x258   :  { %v435_v55 = vmul.f32 0.35355338, %v305_v52  ;;  %447 = vmax.xlane.f32.xlu1 %v446_v53 }
 0x259   :  { %v442_v56 = vsel %vm430_vm5, %v436_v51, -1e+30 }
 0x25a   :  { %v1142_v57 = vpop.f32.mrb[2].mxu1  ;;  %v441_v58 = vsel %vm429_vm6, %v435_v55, -1e+30  ;;  %v455_v59 = vsel %vm445_vm3, %v442_v56, -inf }
 0x25b   :  { %v438_v60 = vmul.f32 0.35355338, %v1142_v57  ;;  %v396_v61 = vpop.f32.mrb[3].mxu1  ;;  %v452_v62 = vsel %vm445_vm3, %v441_v58, -inf }
 0x25c   :  { %v437_v63 = vmul.f32 0.35355338, %v396_v61  ;;  %453 = vmax.xlane.f32.xlu0 %v452_v62  ;;  %456 = vmax.xlane.f32.xlu1 %v455_v59 }
 0x25d   :  { %v444_v0 = vsel %vm432_vm7, %v438_v60, -1e+30 }
 0x25e   :  { %v461_v3 = vsel %vm445_vm3, %v444_v0, -inf  ;;  %v443_v4 = vsel %vm431_vm8, %v437_v63, -1e+30 }
 0x25f   :  { %v458_v6 = vsel %vm445_vm3, %v443_v4, -inf }
 0x260   :  { %462 = vmax.xlane.f32.xlu1 %v461_v3  ;;  %459 = vmax.xlane.f32.xlu0 %v458_v6  ;;  %v601_v6 = vsub.s32 0, %v1471_v24 }
 0x2e4   :  { %v451_v7 = vpop.xlane.xlu0 %450 }
 0x2e5   :  { %v465_v8 = vsub.f32 %v440_v46, %v451_v7  ;;  %v448_v9 = vpop.xlane.xlu1 %447  ;;  %v1504_v7 = vld [vmem:[%s1550_s2] sm:$0x7f]  ;;  %s1383_s2 = smov [#allocation7]  }
 0x2e6   :  { %v464_v10 = vsub.f32 %v439_v49, %v448_v9  ;;  %s1044_s19 = sshll.u32 %s1383_s2, 4  ;;  %s1045_s19 = int_to_ptr.vmem [resolvable:$true] %s1044_s19 }
 0x2e7   :  { %v472_v11 = vmul.f32 1.442695, %v465_v8  ;;  %v602_v8 = vrot.slane %v1504_v7, %v601_v6  ;;  %s1343_s20 = scalar_lea.vmem %s1045_s19, 256  ;;  %p1348_p3 = scmp.lt.s32.totalorder %s1045_s19, %s1045_s19 }
 0x2e8   :  { %v470_v12 = vmul.f32 1.442695, %v464_v10  ;;  %p1344_p2 = scmp.ne.s32.totalorder %s1045_s19, %s1343_s20  ;;  %p1349_p4 = scmp.lt.s32.totalorder %s1343_s20, %s1343_s20 }
 0x2e9   :  { %1267 = vpow2.f32 %v472_v11  ;;  %v454_v13 = vpop.xlane.xlu0 %453  ;;  %v457_v14 = vpop.xlane.xlu1 %456 }
 0x2ea   :  { %1269 = vpow2.f32 %v470_v12  ;;  %v466_v15 = vsub.f32 %v441_v58, %v454_v13  ;;  %v467_v16 = vsub.f32 %v442_v56, %v457_v14  ;;  %p1350_p5 = por %p1349_p4, %p1348_p3 }
 0x2ec   :  { %v474_v17 = vmul.f32 1.442695, %v466_v15  ;;  %v476_v18 = vmul.f32 1.442695, %v467_v16  ;;  %p1351_p6 = pnand %p1350_p5, %p1344_p2 }
 0x2ed   :  { %v463_v19 = vpop.xlane.xlu1 %462  ;;  %v460_v20 = vpop.xlane.xlu0 %459 }
 0x2ee   :  { %1271 = vpow2.f32 %v474_v17  ;;  %v469_v21 = vsub.f32 %v444_v0, %v463_v19  ;;  %v468_v22 = vsub.f32 %v443_v4, %v460_v20 }
 0x2ef   :  { %1273 = vpow2.f32 %v476_v18 }
 0x2f0   :  { %v480_v23 = vmul.f32 1.442695, %v469_v21  ;;  %v478_v25 = vmul.f32 1.442695, %v468_v22 }
 0x2f2   :  { %1275 = vpow2.f32 %v480_v23 }
 0x2f3   :  { %v1268_v26 = vpop.eup %1267  ;;  %1277 = vpow2.f32 %v478_v25 }
 0x2f4   :  { %v1270_v27 = vpop.eup %1269  ;;  %v485_v28 = vsel %vm445_vm3, %v1268_v26, 0.0 }
 0x2f5   :  { %486 = vadd.xlane.f32.xlu1 %v485_v28  ;;  %v482_v29 = vsel %vm445_vm3, %v1270_v27, 0.0  ;;  %v48_v28 = vld [vmem:[#allocation5 + $0x18] sm:$0xff] }
 0x2f6   :  { %483 = vadd.xlane.f32.xlu0 %v482_v29 }
 0x2f8   :  { %v1272_v30 = vpop.eup %1271 }
 0x2f9   :  { %v1274_v31 = vpop.eup %1273  ;;  %v488_v32 = vsel %vm445_vm3, %v1272_v30, 0.0 }
 0x2fa   :  { %v491_v33 = vsel %vm445_vm3, %v1274_v31, 0.0  ;;  %489 = vadd.xlane.f32.xlu0 %v488_v32 }
 0x2fb   :  { %492 = vadd.xlane.f32.xlu1 %v491_v33 }
 0x2fc   :  { %v1276_v34 = vpop.eup %1275 }
 0x2fd   :  { %v1278_v35 = vpop.eup %1277  ;;  %v497_v36 = vsel %vm445_vm3, %v1276_v34, 0.0 }
 0x2fe   :  { %v494_v37 = vsel %vm445_vm3, %v1278_v35, 0.0 }
 0x2ff   :  { %498 = vadd.xlane.f32.xlu1 %v497_v36  ;;  %495 = vadd.xlane.f32.xlu0 %v494_v37  ;;  %v814_v36 = vsub.s32 1, %v1471_v24  ;;  %v820_v37 = vsub.s32 2, %v1471_v24 }
 0x310   :  { %1258 = vrot.lane.b32.xlu1 %v1443_v5, %s1380_s14 }
 0x314   :  { %1263 = vrot.lane.b32.xlu1 %v1443_v5, %s1381_s15 }
 0x315   :  { %1253 = vrot.lane.b32.xlu0 %v1443_v5, %s1382_s16 }
 0x382   :  { %v487_v38 = vpop.xlane.xlu1 %486 }
 0x383   :  { %v484_v39 = vpop.xlane.xlu0 %483 }
 0x384   :  { %1279 = vrcp.f32 %v484_v39 }
 0x385   :  { %1281 = vrcp.f32 %v487_v38  ;;  %v815_v38 = vrot.slane %v1504_v7, %v814_v36 }
 0x387   :  { %v490_v40 = vpop.xlane.xlu0 %489 }
 0x388   :  { %v493_v41 = vpop.xlane.xlu1 %492  ;;  %1283 = vrcp.f32 %v490_v40 }
 0x389   :  { %1285 = vrcp.f32 %v493_v41  ;;  %v821_v41 = vrot.slane %v1504_v7, %v820_v37 }
 0x38c   :  { %v499_v42 = vpop.xlane.xlu1 %498  ;;  %v496_v43 = vpop.xlane.xlu0 %495 }
 0x38d   :  { %1287 = vrcp.f32 %v496_v43 }
 0x38e   :  { %v1280_v44 = vpop.eup %1279  ;;  %1289 = vrcp.f32 %v499_v42 }
 0x38f   :  { %v506_v45 = vmul.f32 %v1280_v44, %v1270_v27  ;;  %v1282_v52 = vpop.eup %1281  ;;  %v47_v27 = vld [vmem:[#allocation5 + $0x10] sm:$0xff] }
 0x390   :  { %v1259_v46 = vpop.permute.xlu1 %1258  ;;  %v1254_v47 = vpop.permute.xlu0 %1253  ;;  %v507_v58 = vmul.f32 %v1282_v52, %v1268_v26  ;;  %v1210_v29 = vpack.c.bf16 %v48_v28, %v47_v27 }
 0x391   :  { %v1261_v48 = vunpack.i.h.bf16 %v1259_v46  ;;  %v1260_v49 = vunpack.i.l.bf16 %v1259_v46  ;;  %v1256_v50 = vunpack.i.h.bf16 %v1254_v47  ;;  %v1255_v51 = vunpack.i.l.bf16 %v1254_v47  ;;  %1147 = vmatprep.mubr.msk.f32.mxu0 %vm445_vm3, %v506_v45 }
 0x392   :  { %v1284_v54 = vpop.eup %1283  ;;  %1211 = vmatprep.subr.bf16.mxu1 %v1210_v29 }
 0x393   :  { %v1198_v5 = vpack.c.bf16 %v1256_v50, %v1255_v51  ;;  %v1202_v55 = vpack.c.bf16 %v1261_v48, %v1260_v49  ;;  %v508_v59 = vmul.f32 %v1284_v54, %v1272_v30  ;;  %v1286_v61 = vpop.eup %1285  ;;  %1213 = vmatpush3.bf16.msra.mxu1 %v1210_v29  ;;  %v49_v48 = vld [vmem:[#allocation5 + $0x20] sm:$0xff]  ;;  %v50_v49 = vld [vmem:[#allocation5 + $0x28] sm:$0xff]  ;;  %v826_v51 = vsub.s32 6, %v1471_v24 }
 0x394   :  { %v1264_v53 = vpop.permute.xlu1 %1263  ;;  %v509_v63 = vmul.f32 %v1286_v61, %v1274_v31  ;;  %v1214_v50 = vpack.c.bf16 %v50_v49, %v49_v48 }
 0x395   :  { %v1266_v56 = vunpack.i.h.bf16 %v1264_v53  ;;  %v1265_v57 = vunpack.i.l.bf16 %v1264_v53  ;;  %1199 = vmatprep.subr.bf16.mxu0 %v1198_v5 }
 0x396   :  { %1201 = vmatpush3.bf16.msra.mxu0 %v1198_v5  ;;  %1215 = vmatprep.subr.bf16.mxu1 %v1214_v50  ;;  %v827_v5 = vrot.slane %v1504_v7, %v826_v51 }
 0x397   :  { %1203 = vmatprep.subr.bf16.mxu0 %v1202_v55  ;;  %v1206_v60 = vpack.c.bf16 %v1266_v56, %v1265_v57  ;;  %v1288_v62 = vpop.eup %1287  ;;  %1217 = vmatpush3.bf16.msra.mxu1 %v1214_v50 }
 0x398   :  { %v510_v0 = vmul.f32 %v1288_v62, %v1278_v35  ;;  %v1290_v3 = vpop.eup %1289 }
 0x399   :  { %1148 = vmatmul.mubr.msk.f32.vlgmr.msra.gmra.mrb[4].mxu0 %vm445_vm3, %v507_v58  ;;  %v511_v4 = vmul.f32 %v1290_v3, %v1276_v34  ;;  %v913_v58 = vsub.s32 3, %v1471_v24 }
 0x39a   :  { %1205 = vmatpush3.bf16.msra.mxu0 %v1202_v55  ;;  %1154 = vmatprep.mubr.msk.f32.mxu0 %vm445_vm3, %v508_v59 }
 0x39b   :  { %1207 = vmatprep.subr.bf16.mxu0 %v1206_v60  ;;  %v914_v59 = vrot.slane %v1504_v7, %v913_v58 }
 0x3a1   :  { %1155 = vmatmul.mubr.msk.f32.vlgmr.msra.gmra.mrb[4].mxu0 %vm445_vm3, %v509_v63 }
 0x3a2   :  { %1209 = vmatpush3.bf16.msra.mxu0 %v1206_v60  ;;  %1161 = vmatprep.mubr.msk.f32.mxu0 %vm445_vm3, %v510_v0 }
 0x3a9   :  { %1162 = vmatmul.mubr.msk.f32.vlgmr.msra.gmra.mrb[4].mxu0 %vm445_vm3, %v511_v4 }
 0x47c   :  { %v1163_v9 = vpop.f32.mrb[4].mxu0 }
 0x47d   :  { %v1218_v10 = vadd.f32 %v1163_v9, %v602_v8  ;;  %v772_v11 = vpop.f32.mrb[5].mxu0 }
 0x47e   :  { %v1219_v12 = vadd.f32 %v772_v11, %v602_v8 }
 0x47f   :  { %v784_v13 = vadd.f32 %v1218_v10, %v1436_v2 }
 0x480   :  { %v783_v14 = vadd.f32 %v1219_v12, %v1434_v1  ;;  %v46_v1 = vld [vmem:[#allocation5 + $0x8] sm:$0xff] }
 0x481   :  { %v788_v15 = vsel %vm52_vm0, %v784_v13, 0.0  ;;  %1164 = vmatprep.subr.mxu0 %v46_v1 }
 0x482   :  { %789 = vadd.xlane.f32.xlu1 %v788_v15  ;;  %v785_v16 = vsel %vm52_vm0, %v783_v14, 0.0  ;;  %1165 = vmatpush3.msra.mxu0 %v46_v1 }
 0x483   :  { %786 = vadd.xlane.f32.xlu0 %v785_v16 }
 0x50f   :  { %v790_v17 = vpop.xlane.xlu1 %789 }
 0x510   :  { %v793_v18 = vmul.f32 0.125, %v790_v17  ;;  %v787_v19 = vpop.xlane.xlu0 %786 }
 0x511   :  { %v792_v20 = vmul.f32 0.125, %v787_v19 }
 0x512   :  { %v795_v21 = vsub.f32 %v784_v13, %v793_v18 }
 0x513   :  { %v794_v22 = vsub.f32 %v783_v14, %v792_v20 }
 0x514   :  { %v797_v26 = vmul.f32 %v795_v21, %v795_v21 }
 0x515   :  { %v796_v23 = vmul.f32 %v794_v22, %v794_v22 }
 0x516   :  { %v801_v2 = vsel %vm52_vm0, %v797_v26, 0.0  ;;  %v1033_v26 = vsub.s32 5, %v1471_v24 }
 0x517   :  { %v798_v25 = vsel %vm52_vm0, %v796_v23, 0.0 }
 0x518   :  { %799 = vadd.xlane.f32.xlu0 %v798_v25  ;;  %v1027_v25 = vsub.s32 4, %v1471_v24  ;;  %v1034_v29 = vrot.slane %v1504_v7, %v1033_v26 }
 0x51c   :  { %802 = vadd.xlane.f32.xlu0 %v801_v2  ;;  %v1028_v2 = vrot.slane %v1504_v7, %v1027_v25 }
 0x5a5   :  { %v800_v30 = vpop.xlane.xlu0 %799 }
 0x5a6   :  { %v804_v31 = vmul.f32 0.125, %v800_v30 }
 0x5a8   :  { %v806_v32 = vadd.f32 1e-05, %v804_v31 }
 0x5a9   :  { %v803_v33 = vpop.xlane.xlu0 %802 }
 0x5aa   :  { %1291 = vrsqrt.f32 %v806_v32  ;;  %v805_v34 = vmul.f32 0.125, %v803_v33 }
 0x5ac   :  { %v807_v35 = vadd.f32 1e-05, %v805_v34 }
 0x5ae   :  { %1293 = vrsqrt.f32 %v807_v35 }
 0x5b4   :  { %v1292_v39 = vpop.eup %1291 }
 0x5b5   :  { %v810_v40 = vmul.f32 %v1292_v39, %v794_v22 }
 0x5b7   :  { %v816_v42 = vmul.f32 %v815_v38, %v810_v40 }
 0x5b8   :  { %v1294_v43 = vpop.eup %1293 }
 0x5b9   :  { %v811_v44 = vmul.f32 %v1294_v43, %v795_v21  ;;  %v822_v45 = vadd.f32 %v821_v41, %v816_v42 }
 0x5bb   :  { %v817_v46 = vmul.f32 %v815_v38, %v811_v44  ;;  %1166 = vmatprep.mubr.msk.f32.mxu0 %vm52_vm0, %v822_v45 }
 0x5bd   :  { %v823_v47 = vadd.f32 %v821_v41, %v817_v46 }
 0x5bf   :  { %1167 = vmatmul.mubr.msk.f32.vlgmr.msra.gmra.mrb[6].mxu0 %vm52_vm0, %v823_v47 }
 0x692   :  { %v1168_v52 = vpop.f32.mrb[6].mxu0 }
 0x693   :  { %v906_v53 = vadd.f32 %v1168_v52, %v827_v5  ;;  %v900_v54 = vpop.f32.mrb[7].mxu0 }
 0x694   :  { %v901_v55 = vadd.f32 %v900_v54, %v827_v5 }
 0x695   :  { %v910_v57 = vmax.f32 %v906_v53, 0.0 }
 0x696   :  { %v909_v56 = vmax.f32 %v901_v55, 0.0 }
 0x698   :  { %1177 = vmatprep.mubr.msk.f32.mxu1 %vm915_vm9, %v909_v56 }
 0x699   :  { %1178 = vmatmul.mubr.msk.f32.vlgmr.msra.gmra.mrb[4].mxu1 %vm915_vm9, %v910_v57 }
 0x76c   :  { %v1179_v60 = vpop.f32.mrb[4].mxu1 }
 0x76d   :  { %v994_v61 = vadd.f32 %v1179_v60, %v914_v59  ;;  %v988_v62 = vpop.f32.mrb[5].mxu1 }
 0x76e   :  { %v989_v63 = vadd.f32 %v988_v62, %v914_v59 }
 0x76f   :  { %v998_v0 = vadd.f32 %v994_v61, %v823_v47 }
 0x770   :  { %v997_v3 = vadd.f32 %v989_v63, %v822_v45 }
 0x771   :  { %v1002_v4 = vsel %vm52_vm0, %v998_v0, 0.0 }
 0x772   :  { %1003 = vadd.xlane.f32.xlu0 %v1002_v4  ;;  %v999_v6 = vsel %vm52_vm0, %v997_v3, 0.0 }
 0x773   :  { %1000 = vadd.xlane.f32.xlu1 %v999_v6 }
 0x7ff   :  { %v1004_v8 = vpop.xlane.xlu0 %1003 }
 0x800   :  { %v1006_v9 = vmul.f32 0.125, %v1004_v8  ;;  %v1001_v10 = vpop.xlane.xlu1 %1000 }
 0x801   :  { %v1005_v11 = vmul.f32 0.125, %v1001_v10 }
 0x802   :  { %v1008_v12 = vsub.f32 %v998_v0, %v1006_v9 }
 0x803   :  { %v1007_v13 = vsub.f32 %v997_v3, %v1005_v11 }
 0x804   :  { %v1010_v14 = vmul.f32 %v1008_v12, %v1008_v12 }
 0x805   :  { %v1009_v15 = vmul.f32 %v1007_v13, %v1007_v13 }
 0x806   :  { %v1014_v16 = vsel %vm52_vm0, %v1010_v14, 0.0 }
 0x807   :  { %1015 = vadd.xlane.f32.xlu0 %v1014_v16  ;;  %v1011_v17 = vsel %vm52_vm0, %v1009_v15, 0.0 }
 0x808   :  { %1012 = vadd.xlane.f32.xlu1 %v1011_v17 }
 0x894   :  { %v1016_v18 = vpop.xlane.xlu0 %1015 }
 0x895   :  { %v1018_v19 = vmul.f32 0.125, %v1016_v18  ;;  %v1013_v20 = vpop.xlane.xlu1 %1012 }
 0x896   :  { %v1017_v21 = vmul.f32 0.125, %v1013_v20 }
 0x897   :  { %v1020_v22 = vadd.f32 1e-05, %v1018_v19 }
 0x898   :  { %v1019_v23 = vadd.f32 1e-05, %v1017_v21 }
 0x899   :  { %1295 = vrsqrt.f32 %v1020_v22 }
 0x89a   :  { %1297 = vrsqrt.f32 %v1019_v23 }
 0x8a3   :  { %v1296_v1 = vpop.eup %1295 }
 0x8a4   :  { %v1298_v27 = vpop.eup %1297  ;;  %v1024_v28 = vmul.f32 %v1296_v1, %v1008_v12 }
 0x8a5   :  { %v1023_v30 = vmul.f32 %v1298_v27, %v1007_v13 }
 0x8a6   :  { %v1030_v31 = vmul.f32 %v1028_v2, %v1024_v28 }
 0x8a7   :  { %v1029_v32 = vmul.f32 %v1028_v2, %v1023_v30 }
 0x8a8   :  { %v1036_v33 = vadd.f32 %v1034_v29, %v1030_v31 }
 0x8a9   :  { %v1035_v34 = vadd.f32 %v1034_v29, %v1029_v32 }
 0x8aa   :  { %1038 = vst.msk [vmem:[#allocation7 + $0x8] sm:$0xff] %vm52_vm0, %v1036_v33 }
 0x8ab   :  { %1037 = vst.msk [vmem:[#allocation7] sm:$0xff] %vm52_vm0, %v1035_v34 }
 0x8ac   :  { %1354 = shalt.err (!%p1351_p6)
}
 0x8ad   :  { %s1355_s25 = scalar_lea.hbm %s1551_s3, 256 }
 0x8ae   :  { %p1356_p7 = scmp.ne.s32.totalorder %s1551_s3, %s1355_s25  ;;  %p1359_p8 = scmp.lt.u32.totalorder %s1355_s25, %s1551_s3 }
 0x8b0   :  { %p1361_p9 = pnand %p1359_p8, %p1356_p7 }
 0x8b2   :  { %1364 = shalt.err (!%p1361_p9)
}
 0x8b3   :  { %1050 = dma.vmem_to_hbm [thread:$0]  %s1045_s19, 256, %s1551_s3, [#allocation4], %s1372_s22, %s1372_s22, %s1373_s23  }
 0x8b4   :  { %1369 = dma.done.wait [#allocation4], 256  }
 0x8b5   :  { %1370 = vsyncadd [#allocation4], 4294967040 }
 0x8b6   :  { %1054 = vsyncpa [#allocation3], 1 }
 0x8b7   :  { %1055 = vsyncpa [#allocation6], 1 }
 0x8b8   :  { %1056 = vsyncpa [#allocation4], 1 }

</bundles_post_ra>
